<compile_context>
chip_gen: v5e
topology: v5e:2x2
jax: 0.10.0
libtpu: 0.0.40
codegen_flags: <defaults>
</compile_context>

<pallas_src>
import functools

import jax
import jax.numpy as jnp
from jax.experimental import pallas as pl
from jax.experimental.pallas import tpu as pltpu

_LANE = 128
_TILE_BUDGET_CAP = 4 << 20   # ~4 MiB tile target (mem-bound roofline sweet spot)
_MAX_B_UNROLL = 64           # cap on static per-batch unroll in the contiguous path
_SMALL_ROW_BYTES = 32 << 10  # below this, strided per-batch reads hurt -> batch-block path


# ---------------------------------------------------------------------------
# Kernels
# ---------------------------------------------------------------------------
def _sign_ste_kernel(x_ref, o_ref):
    """Squeezed-batch path: both refs are (tblk, HWp); pure VPU elementwise."""
    x = x_ref[...]
    o_ref[...] = (x >= jnp.asarray(1.0, dtype=x.dtype)).astype(o_ref.dtype)


def _sign_ste_transpose_kernel(x_ref, o_ref, *, bblk):
    """Batch-sub-block path: x_ref (tblk, bblk, HWp) -> o_ref (bblk, tblk, HWp).

    The (T, B) swap is done with per-batch strided VMEM loads and contiguous
    stores; this is vld/vst filler that hides under the HBM DMA.
    """
    one = jnp.asarray(1.0, dtype=x_ref.dtype)
    for b in range(bblk):  # static unroll, bblk <= _MAX_B_UNROLL
        o_ref[b, :, :] = (x_ref[:, b, :] >= one).astype(o_ref.dtype)


# ---------------------------------------------------------------------------
# Tiling helpers
# ---------------------------------------------------------------------------
def _sublane_pack(dtype) -> int:
    """Sublane packing factor for the dtype (8 f32, 16 bf16, 32 int8/fp8)."""
    return {1: 32, 2: 16, 4: 8}.get(jnp.dtype(dtype).itemsize, 8)


def _vmem_limit_bytes() -> int:
    """Chip-aware scoped-VMEM request: 64 MiB on v5e/v6e, 32 MiB on v7x."""
    try:
        cap = int(pltpu.get_tpu_info().vmem_capacity_bytes)
    except Exception:
        cap = 64 << 20  # conservative (v7x-sized) fallback
    return int(min(64 << 20, max(32 << 20, cap // 2)))


def _round_block(n_max: int, full: int, pack: int) -> int:
    """Largest layout-friendly block <= n_max: the full dim, or a multiple of pack/8."""
    if n_max >= full:
        return full
    if n_max >= pack:
        return (n_max // pack) * pack
    if n_max >= 8:
        return (n_max // 8) * 8
    return min(full, 8)


# ---------------------------------------------------------------------------
# Wrapper
# ---------------------------------------------------------------------------
def dvs_sign_encoder(x: jnp.ndarray,
                     t_block: int | None = None,
                     b_block: int | None = None) -> jnp.ndarray:
    """Pallas implementation of DVSSignEncoder.forward.

    x: (T, B, H, W)  ->  (B, T, H, W) with values in {0, 1}, same dtype.
    """
    T, B, H, W = x.shape
    dtype = x.dtype
    itemsize = jnp.dtype(dtype).itemsize
    pack = _sublane_pack(dtype)

    HW = H * W
    HWp = max(_LANE, pl.cdiv(HW, _LANE) * _LANE)  # lane-dense trailing dim
    row_bytes = HWp * itemsize

    vmem_limit = _vmem_limit_bytes()
    tile_budget = min(_TILE_BUDGET_CAP, vmem_limit // 8)

    # Lane-dense view: merge (H, W) -> HW and pad to a multiple of 128 lanes.
    x3 = x.reshape(T, B, HW)
    if HWp != HW:
        x3 = jnp.pad(x3, ((0, 0), (0, 0), (0, HWp - HW)))

    cost = pl.CostEstimate(
        flops=T * B * HWp,
        transcendentals=0,
        bytes_accessed=2 * T * B * HWp * itemsize,
    )
    cparams = pltpu.CompilerParams(
        dimension_semantics=("parallel", "parallel"),
        vmem_limit_bytes=vmem_limit,
    )

    use_batch_block = (
        B >= 2
        and row_bytes < _SMALL_ROW_BYTES                # per-batch rows are tiny
        and pack * pack * row_bytes <= tile_budget      # packed 2-D blocks fit the budget
    )

    if use_batch_block:
        # --- contiguous-input path: block over both T and B -------------------
        max_b = max(pack, tile_budget // (pack * row_bytes))
        bblk = min(B, _MAX_B_UNROLL, max_b)
        if bblk < B:
            bblk = max(pack, (bblk // pack) * pack)     # keep sublane-packed blocks
        if b_block is not None:
            bblk = max(1, min(B, b_block))

        t_max = max(1, tile_budget // (bblk * row_bytes))
        tblk = _round_block(t_max, T, pack)
        if t_block is not None:
            tblk = max(1, min(T, t_block))

        kernel = functools.partial(_sign_ste_transpose_kernel, bblk=bblk)
        # T axis leads: with bblk == B the batch axis collapses to one iteration,
        # so the T axis is the one v7x can shard across its two TensorCores.
        grid = (pl.cdiv(T, tblk), pl.cdiv(B, bblk))
        out3 = pl.pallas_call(
            kernel,
            out_shape=jax.ShapeDtypeStruct((B, T, HWp), dtype),
            grid=grid,
            in_specs=[pl.BlockSpec((tblk, bblk, HWp), lambda t, b: (t, b, 0))],
            out_specs=pl.BlockSpec((bblk, tblk, HWp), lambda t, b: (b, t, 0)),
            compiler_params=cparams,
            cost_estimate=cost,
        )(x3)
    else:
        # --- squeezed-batch fallback (large HW rows are already big DMA bursts) ---
        t_max = max(1, tile_budget // row_bytes)
        tblk = _round_block(t_max, T, pack)
        if t_block is not None:
            tblk = max(1, min(T, t_block))

        # B axis leads: it always has B iterations here (bblk == 1), so the v7x
        # 2-TC split has work even when tblk == T collapses the T axis.
        grid = (B, pl.cdiv(T, tblk))
        out3 = pl.pallas_call(
            _sign_ste_kernel,
            out_shape=jax.ShapeDtypeStruct((B, T, HWp), dtype),
            grid=grid,
            in_specs=[pl.BlockSpec((tblk, None, HWp), lambda b, t: (t, b, 0))],
            out_specs=pl.BlockSpec((None, tblk, HWp), lambda b, t: (b, t, 0)),
            compiler_params=cparams,
            cost_estimate=cost,
        )(x3)

    out = out3[:, :, :HW] if HWp != HW else out3
    return out.reshape(B, T, H, W)


# Straight-through estimator (Sign_STE.backward is identity); the transpose's
# adjoint swaps the axes back.  Forward is identical to dvs_sign_encoder.
@jax.custom_vjp
def dvs_sign_encoder_ste(x: jnp.ndarray) -> jnp.ndarray:
    return dvs_sign_encoder(x)


def _ste_fwd(x):
    return dvs_sign_encoder(x), None


def _ste_bwd(_, g):
    return (jnp.swapaxes(g, 0, 1),)


dvs_sign_encoder_ste.defvjp(_ste_fwd, _ste_bwd)


def dvs_sign_encoder_ref(x: jnp.ndarray) -> jnp.ndarray:
    """Pure-JAX reference for correctness check."""
    y = jnp.swapaxes(x, 0, 1)
    return (y >= 1.0).astype(y.dtype)


if __name__ == "__main__":
    root = jax.random.PRNGKey(0)
    k1, k2, k3, k4 = jax.random.split(root, 4)

    # 1) Primary DVS-style event tensor: (T=2, B=4, H=16, W=16), contiguous-input path.
    x = jax.random.normal(k1, (2, 4, 16, 16), dtype=jnp.float32) * 2.0
    out = jax.block_until_ready(dvs_sign_encoder(x))
    ref = dvs_sign_encoder_ref(x)
    assert out.shape == ref.shape, (out.shape, ref.shape)
    assert out.dtype == ref.dtype, (out.dtype, ref.dtype)
    assert jnp.array_equal(out, ref), "mismatch vs reference (primary shape)"

    # 2) Multi-block grid over T (T=16 blocked by 8, B=2).
    x2 = jax.random.normal(k2, (16, 2, 8, 32), dtype=jnp.float32) * 2.0
    out2 = jax.block_until_ready(dvs_sign_encoder(x2, t_block=8))
    assert jnp.array_equal(out2, dvs_sign_encoder_ref(x2)), "mismatch (tiled shape)"

    # 3) Large HW rows -> squeezed-batch fallback path.
    x3 = jax.random.normal(k3, (4, 2, 64, 128), dtype=jnp.float32) * 2.0
    out3 = jax.block_until_ready(dvs_sign_encoder(x3))
    assert jnp.array_equal(out3, dvs_sign_encoder_ref(x3)), "mismatch (squeezed path)"

    # 4) HW not a multiple of 128 -> lane-padding path.
    x4 = jax.random.normal(k4, (4, 2, 10, 10), dtype=jnp.float32) * 2.0
    out4 = jax.block_until_ready(dvs_sign_encoder(x4))
    assert jnp.array_equal(out4, dvs_sign_encoder_ref(x4)), "mismatch (padded HW)"

    print("KERNEL_OK")
</pallas_src>

<mosaic_0001>
module attributes {stable_mosaic.version = 11 : i64} {
  func.func @_sign_ste_transpose_kernel(%arg0: i32, %arg1: i32, %arg2: memref<2x4x256xf32, #tpu.memory_space<vmem>>, %arg3: memref<4x2x256xf32, #tpu.memory_space<vmem>>) attributes {dimension_semantics = [#tpu.dimension_semantics<parallel>, #tpu.dimension_semantics<parallel>], iteration_bounds = array<i64: 1, 1>, scalar_prefetch = 0 : i64, scratch_operands = 0 : i64, tpu.core_type = #tpu.core_type<tc>, window_params = [{transform_indices = @transform_0, window_bounds = array<i64: 2, 4, 256>}, {transform_indices = @transform_1, window_bounds = array<i64: 4, 2, 256>}]} {
    %c0 = arith.constant 0 : index
    %c0_0 = arith.constant 0 : index
    %c0_1 = arith.constant 0 : index
    %0 = vector.load %arg2[%c0, %c0_0, %c0_1] : memref<2x4x256xf32, #tpu.memory_space<vmem>>, vector<2x1x256xf32>
    %1 = vector.shape_cast %0 : vector<2x1x256xf32> to vector<2x256xf32>
    %cst = arith.constant 1.000000e+00 : f32
    %2 = vector.broadcast %cst : f32 to vector<2x256xf32>
    %3 = arith.cmpf oge, %1, %2 : vector<2x256xf32>
    %4 = arith.extui %3 : vector<2x256xi1> to vector<2x256xi32>
    %5 = arith.sitofp %4 : vector<2x256xi32> to vector<2x256xf32>
    %c0_2 = arith.constant 0 : index
    %c0_3 = arith.constant 0 : index
    %c0_4 = arith.constant 0 : index
    %6 = vector.load %arg3[%c0_2, %c0_3, %c0_4] : memref<4x2x256xf32, #tpu.memory_space<vmem>>, vector<1x2x256xf32>
    %7 = vector.shape_cast %6 : vector<1x2x256xf32> to vector<2x256xf32>
    %8 = vector.shape_cast %5 : vector<2x256xf32> to vector<1x2x256xf32>
    tpu.vector_store %arg3[%c0_2, %c0_3, %c0_4], %8 {strides = array<i32>} : memref<4x2x256xf32, #tpu.memory_space<vmem>>, vector<1x2x256xf32>,
    %c0_5 = arith.constant 0 : index
    %c1 = arith.constant 1 : index
    %c0_6 = arith.constant 0 : index
    %9 = vector.load %arg2[%c0_5, %c1, %c0_6] : memref<2x4x256xf32, #tpu.memory_space<vmem>>, vector<2x1x256xf32>
    %10 = vector.shape_cast %9 : vector<2x1x256xf32> to vector<2x256xf32>
    %cst_7 = arith.constant 1.000000e+00 : f32
    %11 = vector.broadcast %cst_7 : f32 to vector<2x256xf32>
    %12 = arith.cmpf oge, %10, %11 : vector<2x256xf32>
    %13 = arith.extui %12 : vector<2x256xi1> to vector<2x256xi32>
    %14 = arith.sitofp %13 : vector<2x256xi32> to vector<2x256xf32>
    %c1_8 = arith.constant 1 : index
    %c0_9 = arith.constant 0 : index
    %c0_10 = arith.constant 0 : index
    %15 = vector.load %arg3[%c1_8, %c0_9, %c0_10] : memref<4x2x256xf32, #tpu.memory_space<vmem>>, vector<1x2x256xf32>
    %16 = vector.shape_cast %15 : vector<1x2x256xf32> to vector<2x256xf32>
    %17 = vector.shape_cast %14 : vector<2x256xf32> to vector<1x2x256xf32>
    tpu.vector_store %arg3[%c1_8, %c0_9, %c0_10], %17 {strides = array<i32>} : memref<4x2x256xf32, #tpu.memory_space<vmem>>, vector<1x2x256xf32>,
    %c0_11 = arith.constant 0 : index
    %c2 = arith.constant 2 : index
    %c0_12 = arith.constant 0 : index
    %18 = vector.load %arg2[%c0_11, %c2, %c0_12] : memref<2x4x256xf32, #tpu.memory_space<vmem>>, vector<2x1x256xf32>
    %19 = vector.shape_cast %18 : vector<2x1x256xf32> to vector<2x256xf32>
    %cst_13 = arith.constant 1.000000e+00 : f32
    %20 = vector.broadcast %cst_13 : f32 to vector<2x256xf32>
    %21 = arith.cmpf oge, %19, %20 : vector<2x256xf32>
    %22 = arith.extui %21 : vector<2x256xi1> to vector<2x256xi32>
    %23 = arith.sitofp %22 : vector<2x256xi32> to vector<2x256xf32>
    %c2_14 = arith.constant 2 : index
    %c0_15 = arith.constant 0 : index
    %c0_16 = arith.constant 0 : index
    %24 = vector.load %arg3[%c2_14, %c0_15, %c0_16] : memref<4x2x256xf32, #tpu.memory_space<vmem>>, vector<1x2x256xf32>
    %25 = vector.shape_cast %24 : vector<1x2x256xf32> to vector<2x256xf32>
    %26 = vector.shape_cast %23 : vector<2x256xf32> to vector<1x2x256xf32>
    tpu.vector_store %arg3[%c2_14, %c0_15, %c0_16], %26 {strides = array<i32>} : memref<4x2x256xf32, #tpu.memory_space<vmem>>, vector<1x2x256xf32>,
    %c0_17 = arith.constant 0 : index
    %c3 = arith.constant 3 : index
    %c0_18 = arith.constant 0 : index
    %27 = vector.load %arg2[%c0_17, %c3, %c0_18] : memref<2x4x256xf32, #tpu.memory_space<vmem>>, vector<2x1x256xf32>
    %28 = vector.shape_cast %27 : vector<2x1x256xf32> to vector<2x256xf32>
    %cst_19 = arith.constant 1.000000e+00 : f32
    %29 = vector.broadcast %cst_19 : f32 to vector<2x256xf32>
    %30 = arith.cmpf oge, %28, %29 : vector<2x256xf32>
    %31 = arith.extui %30 : vector<2x256xi1> to vector<2x256xi32>
    %32 = arith.sitofp %31 : vector<2x256xi32> to vector<2x256xf32>
    %c3_20 = arith.constant 3 : index
    %c0_21 = arith.constant 0 : index
    %c0_22 = arith.constant 0 : index
    %33 = vector.load %arg3[%c3_20, %c0_21, %c0_22] : memref<4x2x256xf32, #tpu.memory_space<vmem>>, vector<1x2x256xf32>
    %34 = vector.shape_cast %33 : vector<1x2x256xf32> to vector<2x256xf32>
    %35 = vector.shape_cast %32 : vector<2x256xf32> to vector<1x2x256xf32>
    tpu.vector_store %arg3[%c3_20, %c0_21, %c0_22], %35 {strides = array<i32>} : memref<4x2x256xf32, #tpu.memory_space<vmem>>, vector<1x2x256xf32>,
    return
  }
  func.func @transform_0(%arg0: i32, %arg1: i32) -> (i32, i32, i32) {
    %c0_i32 = arith.constant 0 : i32
    %c0_i32_0 = arith.constant 0 : i32
    return %arg0, %arg1, %c0_i32 : i32, i32, i32
  }
  func.func @transform_1(%arg0: i32, %arg1: i32) -> (i32, i32, i32) {
    %c0_i32 = arith.constant 0 : i32
    %c0_i32_0 = arith.constant 0 : i32
    return %arg1, %arg0, %c0_i32 : i32, i32, i32
  }
}

</mosaic_0001>

<bundles_post_ra>
// kernel: tpu_custom_call.1
= control target key start
LH: loop header
LB: loop body
LE: loop exit
PB: predicated region body
PF: predicated region fallthrough
CT: control target
= control target key end

     0   :  { %6 = vsyncpa [#allocation3], 0  ;;  %s208_s0 = inlined_call_operand.hbm [shape: f32[2,4,256], index: 0, kind: input, shape index: {}]   ;;  %s209_s1 = inlined_call_operand.hbm [shape: f32[4,2,256], index: 1, kind: output, shape index: {}]  }
   0x1   :  { %7 = vsyncpa [#allocation4], 0  ;;  %s12_s8 = sshll.u32 %s208_s0, 4  ;;  %s185_s9 = smov [#allocation2]   ;;  %s13_s8 = int_to_ptr.hbm [resolvable:$true] %s12_s8 }
   0x2   :  { %s14_s10 = sshll.u32 %s185_s9, 4  ;;  %s186_s11 = smov 128   ;;  %s15_s10 = int_to_ptr.vmem [resolvable:$true] %s14_s10 }
   0x3   :  { %s187_s12 = smov 8  }
   0x4   :  { %20 = dma.hbm_to_vmem [thread:$0]  %s13_s8, 256, %s15_s10, [#allocation3], %s186_s11, %s186_s11, %s187_s12  }
   0x5   :  { %181 = dma.done.wait [#allocation3], 256  }
   0x6   :  { %182 = vsyncadd [#allocation3], 4294967040  ;;  %v25_v0 = vld [vmem:[#allocation2] ss:$4 sm:$0x3]  ;;  %v188_v2 = vmov 0.0  }
   0x7   :  { %v27_v1 = vld [vmem:[#allocation2 + $0x8] ss:$4 sm:$0x3]  ;;  %vm28_vm0 = vcmp.ge.f32.partialorder %v25_v0, 1.0  ;;  %s189_s0 = smov [#allocation5]   ;;  %s105_s16 = sshll.u32 %s209_s1, 4  ;;  %s106_s16 = int_to_ptr.hbm [resolvable:$true] %s105_s16 }
   0x8   :  { %vm29_vm1 = vcmp.ge.f32.partialorder %v27_v1, 1.0  ;;  %v118_v3 = vsel %vm28_vm0, 1.0, %v188_v2  ;;  %v43_v5 = vld [vmem:[#allocation2 + $0x1] ss:$4 sm:$0x3]  ;;  %s103_s13 = sshll.u32 %s189_s0, 4  ;;  %s104_s13 = int_to_ptr.vmem [resolvable:$true] %s103_s13 }
   0x9   :  { %v119_v4 = vsel %vm29_vm1, 1.0, %v188_v2  ;;  %36 = vst [vmem:[#allocation1] ss:$2 sm:$0xff] %v118_v3  ;;  %v45_v6 = vld [vmem:[#allocation2 + $0x9] ss:$4 sm:$0x3] }
   0xa   :  { %38 = vst [vmem:[#allocation1 + $0x1] ss:$2 sm:$0xff] %v119_v4  ;;  %vm46_vm2 = vcmp.ge.f32.partialorder %v43_v5, 1.0  ;;  %vm47_vm3 = vcmp.ge.f32.partialorder %v45_v6, 1.0  ;;  %s190_s17 = smov 64   ;;  %s191_s18 = smov 4  }
   0xb   :  { %v120_v7 = vsel %vm46_vm2, 1.0, %v188_v2  ;;  %v121_v9 = vsel %vm47_vm3, 1.0, %v188_v2  ;;  %v62_v10 = vld [vmem:[#allocation2 + $0x2] ss:$4 sm:$0x3] }
   0xc   :  { %v64_v11 = vld [vmem:[#allocation2 + $0xa] ss:$4 sm:$0x3]  ;;  %vm65_vm4 = vcmp.ge.f32.partialorder %v62_v10, 1.0 }
   0xd   :  { %vm66_vm5 = vcmp.ge.f32.partialorder %v64_v11, 1.0  ;;  %v122_v12 = vsel %vm65_vm4, 1.0, %v188_v2  ;;  %v81_v15 = vld [vmem:[#allocation2 + $0x3] ss:$4 sm:$0x3] }
   0xe   :  { %v123_v14 = vsel %vm66_vm5, 1.0, %v188_v2  ;;  %v83_v16 = vld [vmem:[#allocation2 + $0xb] ss:$4 sm:$0x3]  ;;  %vm84_vm6 = vcmp.ge.f32.partialorder %v81_v15, 1.0 }
   0xf   :  { %vm85_vm7 = vcmp.ge.f32.partialorder %v83_v16, 1.0  ;;  %v124_v17 = vsel %vm84_vm6, 1.0, %v188_v2 }
  0x10   :  { %v125_v19 = vsel %vm85_vm7, 1.0, %v188_v2 }
  0x11   :  { %v39_v8 = vld [vmem:[#allocation1] sm:$0xff] }
  0x12   :  { %41 = vst [vmem:[#allocation5] sm:$0xf] %v39_v8 }
  0x13   :  { %54 = vst [vmem:[#allocation1] ss:$2 sm:$0xff] %v120_v7 }
  0x14   :  { %56 = vst [vmem:[#allocation1 + $0x1] ss:$2 sm:$0xff] %v121_v9 }
  0x1b   :  { %v57_v13 = vld [vmem:[#allocation1] sm:$0xff] }
  0x1c   :  { %60 = vst [vmem:[#allocation5 + $0x4] sm:$0xf] %v57_v13 }
  0x1d   :  { %73 = vst [vmem:[#allocation1] ss:$2 sm:$0xff] %v122_v12 }
  0x1e   :  { %75 = vst [vmem:[#allocation1 + $0x1] ss:$2 sm:$0xff] %v123_v14 }
  0x25   :  { %v76_v18 = vld [vmem:[#allocation1] sm:$0xff] }
  0x26   :  { %79 = vst [vmem:[#allocation5 + $0x8] sm:$0xf] %v76_v18 }
  0x27   :  { %92 = vst [vmem:[#allocation1] ss:$2 sm:$0xff] %v124_v17 }
  0x28   :  { %94 = vst [vmem:[#allocation1 + $0x1] ss:$2 sm:$0xff] %v125_v19 }
  0x2f   :  { %v95_v20 = vld [vmem:[#allocation1] sm:$0xff] }
  0x30   :  { %98 = vst [vmem:[#allocation5 + $0xc] sm:$0xf] %v95_v20 }
  0x31   :  { %111 = dma.vmem_to_hbm [thread:$0]  %s104_s13, 256, %s106_s16, [#allocation4], %s190_s17, %s190_s17, %s191_s18  }
  0x32   :  { %183 = dma.done.wait [#allocation4], 256  }
  0x33   :  { %184 = vsyncadd [#allocation4], 4294967040 }
  0x34   :  { %116 = vsyncpa [#allocation3], 1 }
  0x35   :  { %117 = vsyncpa [#allocation4], 1 }

</bundles_post_ra>
